<compile_context>
chip_gen: v7x
topology: tpu7x:2x2x1
jax: 0.10.0
libtpu: 0.0.40
codegen_flags: <defaults>
</compile_context>

<pallas_src>
import jax
import jax.numpy as jnp
import numpy as np
from jax import lax
from jax.experimental import pallas as pl
from jax.experimental.pallas import tpu as pltpu


def lstm_last_h_kernel(x_ref, wih_ref, whh_ref, b_ref, h_ref):
    """Single-layer LSTM (hidden_size = 1); writes the final hidden state h_T.

    x_ref:   (B, T*I)  per-batch flattened (seq, input) samples (lane-dense)
    wih_ref: (4, I)    W_ih   (PyTorch gate order i, f, g, o)
    whh_ref: (4, 1)    W_hh   (hidden_size = 1)
    b_ref:   (4, 1)    b_ih + b_hh
    h_ref:   (1, B)    output h_T, batch on the lane axis (lane-dense store)
    """
    B = x_ref.shape[0]
    I = wih_ref.shape[1]
    T = x_ref.shape[1] // I

    x = x_ref[...]              # (B, T*I)
    wih = wih_ref[...]          # (4, I)
    whh = whh_ref[...]          # (4, 1)
    b = b_ref[...]              # (4, 1)

    # ---- hoisted input projection (no dependence on h/c) --------------------
    # gx[t, g, b'] = bias[g] + sum_i W_ih[g, i] * x[b', t*I + i]
    # Laid out (T, 4, B): each timestep's 4 gate pre-activations are one
    # whole-tile slice gx[t] of shape (4, B), batch on lanes.
    gx = None
    for i in range(I):          # I is tiny (default 1); static Python loop
        # For I == 1 no slicing is needed; for I > 1 pick the i-th input channel.
        xi = x if I == 1 else x[:, i::I]                      # (B, T)
        term = xi.T[:, None, :] * wih[None, :, i:i + 1]       # (T,1,B)*(1,4,1)->(T,4,B)
        gx = term if gx is None else gx + term
    gx = gx + b[None, :, :]                                   # (T, 4, B)

    # ---- serial recurrence: fully unrolled, only truly recurrent ops inside --
    h = jnp.zeros((1, B), jnp.float32)
    c = jnp.zeros((1, B), jnp.float32)
    for t in range(T):                                        # static unroll
        g_pre = gx[t] + whh * h                               # (4, B)
        sig = jax.nn.sigmoid(g_pre)                           # fused: i, f, o gates
        g_act = jnp.tanh(g_pre[2:3, :])                       # candidate gate
        c = sig[1:2, :] * c + sig[0:1, :] * g_act
        h = sig[3:4, :] * jnp.tanh(c)

    h_ref[...] = h                                            # lane-dense store


def recurrent_differentiable_or(proba, w_ih, w_hh, b_ih, b_hh):
    """Matches RecurrentDifferentiableOR.forward; returns h of shape (1, B, 1).

    PyTorch does proba.view(B, D2, D1) -- a raw reshape, NOT a transpose -- and
    feeds it to the LSTM as (batch, seq=D2, input=D1). Since that view has the
    same flat layout per batch row, the kernel can consume proba.reshape(B, T*I)
    directly: no wrapper transpose, no copy.
    """
    B, D1, D2 = proba.shape
    I, T = D1, D2

    x2d = jnp.asarray(proba, jnp.float32).reshape(B, T * I)   # (B, T*I) pure view
    wih = jnp.asarray(w_ih, jnp.float32)                      # (4, I)
    whh = jnp.asarray(w_hh, jnp.float32).reshape(4, 1)        # (4, 1)
    bias = (jnp.asarray(b_ih, jnp.float32)
            + jnp.asarray(b_hh, jnp.float32)).reshape(4, 1)   # (4, 1)

    h = pl.pallas_call(
        lstm_last_h_kernel,
        out_shape=jax.ShapeDtypeStruct((1, B), jnp.float32),
        in_specs=[pl.BlockSpec(memory_space=pltpu.MemorySpace.VMEM)] * 4,
        out_specs=pl.BlockSpec(memory_space=pltpu.MemorySpace.VMEM),
    )(x2d, wih, whh, bias)

    return h.reshape(1, B, 1)                                 # (num_layers=1, B, hidden=1)


def _reference_lstm_last_h(proba, w_ih, w_hh, b_ih, b_hh):
    """Pure-JAX reference of the same LSTM (for a sanity check)."""
    B, D1, D2 = proba.shape
    x = proba.reshape(B, D2, D1).astype(jnp.float32)          # (B, T, I)
    b = b_ih + b_hh

    def step(carry, x_t):
        h, c = carry                                          # (B, 1)
        g = x_t @ w_ih.T + h @ w_hh.T + b                     # (B, 4)
        i_g = jax.nn.sigmoid(g[:, 0:1])
        f_g = jax.nn.sigmoid(g[:, 1:2])
        g_g = jnp.tanh(g[:, 2:3])
        o_g = jax.nn.sigmoid(g[:, 3:4])
        c_new = f_g * c + i_g * g_g
        h_new = o_g * jnp.tanh(c_new)
        return (h_new, c_new), None

    h0 = jnp.zeros((B, 1), jnp.float32)
    c0 = jnp.zeros((B, 1), jnp.float32)
    (h_fin, _), _ = lax.scan(step, (h0, c0), jnp.transpose(x, (1, 0, 2)))
    return h_fin.reshape(1, B, 1)


if __name__ == "__main__":
    input_size = 1       # module default
    hidden_size = 1
    B, T = 2, 8          # proba_tensor: (batch, input_size, seq) = (2, 1, 8)

    key = jax.random.PRNGKey(0)
    k_x, k_wih, k_whh, k_bih, k_bhh = jax.random.split(key, 5)

    # PyTorch-style init: U(-1/sqrt(hidden), 1/sqrt(hidden)) = U(-1, 1) here.
    w_ih = jax.random.uniform(k_wih, (4 * hidden_size, input_size),
                              minval=-1.0, maxval=1.0, dtype=jnp.float32)
    w_hh = jax.random.uniform(k_whh, (4 * hidden_size, hidden_size),
                              minval=-1.0, maxval=1.0, dtype=jnp.float32)
    b_ih = jax.random.uniform(k_bih, (4 * hidden_size,),
                              minval=-1.0, maxval=1.0, dtype=jnp.float32)
    b_hh = jax.random.uniform(k_bhh, (4 * hidden_size,),
                              minval=-1.0, maxval=1.0, dtype=jnp.float32)

    proba = jax.random.uniform(k_x, (B, input_size, T), dtype=jnp.float32)

    h = jax.block_until_ready(
        recurrent_differentiable_or(proba, w_ih, w_hh, b_ih, b_hh))

    h_ref = jax.block_until_ready(
        _reference_lstm_last_h(proba, w_ih, w_hh, b_ih, b_hh))

    assert h.shape == (1, B, 1)
    np.testing.assert_allclose(np.asarray(h), np.asarray(h_ref),
                               rtol=1e-5, atol=1e-5)
    print("KERNEL_OK")
</pallas_src>

<mosaic_0001>
module attributes {stable_mosaic.version = 11 : i64} {
  func.func @lstm_last_h_kernel(%arg0: memref<2x8xf32, #tpu.memory_space<vmem>>, %arg1: memref<4x1xf32, #tpu.memory_space<vmem>>, %arg2: memref<4x1xf32, #tpu.memory_space<vmem>>, %arg3: memref<4x1xf32, #tpu.memory_space<vmem>>, %arg4: memref<1x2xf32, #tpu.memory_space<vmem>>) attributes {dimension_semantics = [], scalar_prefetch = 0 : i64, scratch_operands = 0 : i64, tpu.core_type = #tpu.core_type<tc>} {
    %c0 = arith.constant 0 : index
    %c0_0 = arith.constant 0 : index
    %0 = vector.load %arg0[%c0, %c0_0] : memref<2x8xf32, #tpu.memory_space<vmem>>, vector<2x8xf32>
    %c0_1 = arith.constant 0 : index
    %c0_2 = arith.constant 0 : index
    %1 = vector.load %arg1[%c0_1, %c0_2] : memref<4x1xf32, #tpu.memory_space<vmem>>, vector<4x1xf32>
    %c0_3 = arith.constant 0 : index
    %c0_4 = arith.constant 0 : index
    %2 = vector.load %arg2[%c0_3, %c0_4] : memref<4x1xf32, #tpu.memory_space<vmem>>, vector<4x1xf32>
    %c0_5 = arith.constant 0 : index
    %c0_6 = arith.constant 0 : index
    %3 = vector.load %arg3[%c0_5, %c0_6] : memref<4x1xf32, #tpu.memory_space<vmem>>, vector<4x1xf32>
    %4 = tpu.transpose %0, [1, 0] : vector<2x8xf32> -> vector<8x2xf32>
    %5 = vector.shape_cast %4 : vector<8x2xf32> to vector<8x1x2xf32>
    %6 = vector.shape_cast %1 : vector<4x1xf32> to vector<1x4x1xf32>
    %7 = vector.broadcast %5 : vector<8x1x2xf32> to vector<8x4x2xf32>
    %8 = vector.broadcast %6 : vector<1x4x1xf32> to vector<8x4x2xf32>
    %9 = arith.mulf %7, %8 : vector<8x4x2xf32>
    %10 = vector.shape_cast %3 : vector<4x1xf32> to vector<1x4x1xf32>
    %11 = vector.broadcast %10 : vector<1x4x1xf32> to vector<8x4x2xf32>
    %12 = arith.addf %9, %11 : vector<8x4x2xf32>
    %cst = arith.constant 0.000000e+00 : f32
    %13 = vector.broadcast %cst : f32 to vector<1x2xf32>
    %cst_7 = arith.constant 0.000000e+00 : f32
    %14 = vector.broadcast %cst_7 : f32 to vector<1x2xf32>
    %15 = vector.extract_strided_slice %12 {offsets = [0, 0, 0], sizes = [1, 4, 2], strides = [1, 1, 1]} : vector<8x4x2xf32> to vector<1x4x2xf32>
    %16 = vector.shape_cast %15 : vector<1x4x2xf32> to vector<4x2xf32>
    %17 = vector.broadcast %2 : vector<4x1xf32> to vector<4x2xf32>
    %18 = vector.broadcast %13 : vector<1x2xf32> to vector<4x2xf32>
    %19 = arith.mulf %17, %18 : vector<4x2xf32>
    %20 = arith.addf %16, %19 : vector<4x2xf32>
    %21 = arith.negf %20 : vector<4x2xf32>
    %22 = math.exp %21 : vector<4x2xf32>
    %cst_8 = arith.constant 1.000000e+00 : f32
    %23 = vector.broadcast %cst_8 : f32 to vector<4x2xf32>
    %24 = arith.addf %23, %22 : vector<4x2xf32>
    %25 = arith.divf %23, %24 : vector<4x2xf32>
    %26 = vector.extract_strided_slice %20 {offsets = [2, 0], sizes = [1, 2], strides = [1, 1]} : vector<4x2xf32> to vector<1x2xf32>
    %27 = math.tanh %26 : vector<1x2xf32>
    %28 = vector.extract_strided_slice %25 {offsets = [1, 0], sizes = [1, 2], strides = [1, 1]} : vector<4x2xf32> to vector<1x2xf32>
    %29 = arith.mulf %28, %14 : vector<1x2xf32>
    %30 = vector.extract_strided_slice %25 {offsets = [0, 0], sizes = [1, 2], strides = [1, 1]} : vector<4x2xf32> to vector<1x2xf32>
    %31 = arith.mulf %30, %27 : vector<1x2xf32>
    %32 = arith.addf %29, %31 : vector<1x2xf32>
    %33 = vector.extract_strided_slice %25 {offsets = [3, 0], sizes = [1, 2], strides = [1, 1]} : vector<4x2xf32> to vector<1x2xf32>
    %34 = math.tanh %32 : vector<1x2xf32>
    %35 = arith.mulf %33, %34 : vector<1x2xf32>
    %36 = vector.extract_strided_slice %12 {offsets = [1, 0, 0], sizes = [1, 4, 2], strides = [1, 1, 1]} : vector<8x4x2xf32> to vector<1x4x2xf32>
    %37 = vector.shape_cast %36 : vector<1x4x2xf32> to vector<4x2xf32>
    %38 = vector.broadcast %2 : vector<4x1xf32> to vector<4x2xf32>
    %39 = vector.broadcast %35 : vector<1x2xf32> to vector<4x2xf32>
    %40 = arith.mulf %38, %39 : vector<4x2xf32>
    %41 = arith.addf %37, %40 : vector<4x2xf32>
    %42 = arith.negf %41 : vector<4x2xf32>
    %43 = math.exp %42 : vector<4x2xf32>
    %cst_9 = arith.constant 1.000000e+00 : f32
    %44 = vector.broadcast %cst_9 : f32 to vector<4x2xf32>
    %45 = arith.addf %44, %43 : vector<4x2xf32>
    %46 = arith.divf %44, %45 : vector<4x2xf32>
    %47 = vector.extract_strided_slice %41 {offsets = [2, 0], sizes = [1, 2], strides = [1, 1]} : vector<4x2xf32> to vector<1x2xf32>
    %48 = math.tanh %47 : vector<1x2xf32>
    %49 = vector.extract_strided_slice %46 {offsets = [1, 0], sizes = [1, 2], strides = [1, 1]} : vector<4x2xf32> to vector<1x2xf32>
    %50 = arith.mulf %49, %32 : vector<1x2xf32>
    %51 = vector.extract_strided_slice %46 {offsets = [0, 0], sizes = [1, 2], strides = [1, 1]} : vector<4x2xf32> to vector<1x2xf32>
    %52 = arith.mulf %51, %48 : vector<1x2xf32>
    %53 = arith.addf %50, %52 : vector<1x2xf32>
    %54 = vector.extract_strided_slice %46 {offsets = [3, 0], sizes = [1, 2], strides = [1, 1]} : vector<4x2xf32> to vector<1x2xf32>
    %55 = math.tanh %53 : vector<1x2xf32>
    %56 = arith.mulf %54, %55 : vector<1x2xf32>
    %57 = vector.extract_strided_slice %12 {offsets = [2, 0, 0], sizes = [1, 4, 2], strides = [1, 1, 1]} : vector<8x4x2xf32> to vector<1x4x2xf32>
    %58 = vector.shape_cast %57 : vector<1x4x2xf32> to vector<4x2xf32>
    %59 = vector.broadcast %2 : vector<4x1xf32> to vector<4x2xf32>
    %60 = vector.broadcast %56 : vector<1x2xf32> to vector<4x2xf32>
    %61 = arith.mulf %59, %60 : vector<4x2xf32>
    %62 = arith.addf %58, %61 : vector<4x2xf32>
    %63 = arith.negf %62 : vector<4x2xf32>
    %64 = math.exp %63 : vector<4x2xf32>
    %cst_10 = arith.constant 1.000000e+00 : f32
    %65 = vector.broadcast %cst_10 : f32 to vector<4x2xf32>
    %66 = arith.addf %65, %64 : vector<4x2xf32>
    %67 = arith.divf %65, %66 : vector<4x2xf32>
    %68 = vector.extract_strided_slice %62 {offsets = [2, 0], sizes = [1, 2], strides = [1, 1]} : vector<4x2xf32> to vector<1x2xf32>
    %69 = math.tanh %68 : vector<1x2xf32>
    %70 = vector.extract_strided_slice %67 {offsets = [1, 0], sizes = [1, 2], strides = [1, 1]} : vector<4x2xf32> to vector<1x2xf32>
    %71 = arith.mulf %70, %53 : vector<1x2xf32>
    %72 = vector.extract_strided_slice %67 {offsets = [0, 0], sizes = [1, 2], strides = [1, 1]} : vector<4x2xf32> to vector<1x2xf32>
    %73 = arith.mulf %72, %69 : vector<1x2xf32>
    %74 = arith.addf %71, %73 : vector<1x2xf32>
    %75 = vector.extract_strided_slice %67 {offsets = [3, 0], sizes = [1, 2], strides = [1, 1]} : vector<4x2xf32> to vector<1x2xf32>
    %76 = math.tanh %74 : vector<1x2xf32>
    %77 = arith.mulf %75, %76 : vector<1x2xf32>
    %78 = vector.extract_strided_slice %12 {offsets = [3, 0, 0], sizes = [1, 4, 2], strides = [1, 1, 1]} : vector<8x4x2xf32> to vector<1x4x2xf32>
    %79 = vector.shape_cast %78 : vector<1x4x2xf32> to vector<4x2xf32>
    %80 = vector.broadcast %2 : vector<4x1xf32> to vector<4x2xf32>
    %81 = vector.broadcast %77 : vector<1x2xf32> to vector<4x2xf32>
    %82 = arith.mulf %80, %81 : vector<4x2xf32>
    %83 = arith.addf %79, %82 : vector<4x2xf32>
    %84 = arith.negf %83 : vector<4x2xf32>
    %85 = math.exp %84 : vector<4x2xf32>
    %cst_11 = arith.constant 1.000000e+00 : f32
    %86 = vector.broadcast %cst_11 : f32 to vector<4x2xf32>
    %87 = arith.addf %86, %85 : vector<4x2xf32>
    %88 = arith.divf %86, %87 : vector<4x2xf32>
    %89 = vector.extract_strided_slice %83 {offsets = [2, 0], sizes = [1, 2], strides = [1, 1]} : vector<4x2xf32> to vector<1x2xf32>
    %90 = math.tanh %89 : vector<1x2xf32>
    %91 = vector.extract_strided_slice %88 {offsets = [1, 0], sizes = [1, 2], strides = [1, 1]} : vector<4x2xf32> to vector<1x2xf32>
    %92 = arith.mulf %91, %74 : vector<1x2xf32>
    %93 = vector.extract_strided_slice %88 {offsets = [0, 0], sizes = [1, 2], strides = [1, 1]} : vector<4x2xf32> to vector<1x2xf32>
    %94 = arith.mulf %93, %90 : vector<1x2xf32>
    %95 = arith.addf %92, %94 : vector<1x2xf32>
    %96 = vector.extract_strided_slice %88 {offsets = [3, 0], sizes = [1, 2], strides = [1, 1]} : vector<4x2xf32> to vector<1x2xf32>
    %97 = math.tanh %95 : vector<1x2xf32>
    %98 = arith.mulf %96, %97 : vector<1x2xf32>
    %99 = vector.extract_strided_slice %12 {offsets = [4, 0, 0], sizes = [1, 4, 2], strides = [1, 1, 1]} : vector<8x4x2xf32> to vector<1x4x2xf32>
    %100 = vector.shape_cast %99 : vector<1x4x2xf32> to vector<4x2xf32>
    %101 = vector.broadcast %2 : vector<4x1xf32> to vector<4x2xf32>
    %102 = vector.broadcast %98 : vector<1x2xf32> to vector<4x2xf32>
    %103 = arith.mulf %101, %102 : vector<4x2xf32>
    %104 = arith.addf %100, %103 : vector<4x2xf32>
    %105 = arith.negf %104 : vector<4x2xf32>
    %106 = math.exp %105 : vector<4x2xf32>
    %cst_12 = arith.constant 1.000000e+00 : f32
    %107 = vector.broadcast %cst_12 : f32 to vector<4x2xf32>
    %108 = arith.addf %107, %106 : vector<4x2xf32>
    %109 = arith.divf %107, %108 : vector<4x2xf32>
    %110 = vector.extract_strided_slice %104 {offsets = [2, 0], sizes = [1, 2], strides = [1, 1]} : vector<4x2xf32> to vector<1x2xf32>
    %111 = math.tanh %110 : vector<1x2xf32>
    %112 = vector.extract_strided_slice %109 {offsets = [1, 0], sizes = [1, 2], strides = [1, 1]} : vector<4x2xf32> to vector<1x2xf32>
    %113 = arith.mulf %112, %95 : vector<1x2xf32>
    %114 = vector.extract_strided_slice %109 {offsets = [0, 0], sizes = [1, 2], strides = [1, 1]} : vector<4x2xf32> to vector<1x2xf32>
    %115 = arith.mulf %114, %111 : vector<1x2xf32>
    %116 = arith.addf %113, %115 : vector<1x2xf32>
    %117 = vector.extract_strided_slice %109 {offsets = [3, 0], sizes = [1, 2], strides = [1, 1]} : vector<4x2xf32> to vector<1x2xf32>
    %118 = math.tanh %116 : vector<1x2xf32>
    %119 = arith.mulf %117, %118 : vector<1x2xf32>
    %120 = vector.extract_strided_slice %12 {offsets = [5, 0, 0], sizes = [1, 4, 2], strides = [1, 1, 1]} : vector<8x4x2xf32> to vector<1x4x2xf32>
    %121 = vector.shape_cast %120 : vector<1x4x2xf32> to vector<4x2xf32>
    %122 = vector.broadcast %2 : vector<4x1xf32> to vector<4x2xf32>
    %123 = vector.broadcast %119 : vector<1x2xf32> to vector<4x2xf32>
    %124 = arith.mulf %122, %123 : vector<4x2xf32>
    %125 = arith.addf %121, %124 : vector<4x2xf32>
    %126 = arith.negf %125 : vector<4x2xf32>
    %127 = math.exp %126 : vector<4x2xf32>
    %cst_13 = arith.constant 1.000000e+00 : f32
    %128 = vector.broadcast %cst_13 : f32 to vector<4x2xf32>
    %129 = arith.addf %128, %127 : vector<4x2xf32>
    %130 = arith.divf %128, %129 : vector<4x2xf32>
    %131 = vector.extract_strided_slice %125 {offsets = [2, 0], sizes = [1, 2], strides = [1, 1]} : vector<4x2xf32> to vector<1x2xf32>
    %132 = math.tanh %131 : vector<1x2xf32>
    %133 = vector.extract_strided_slice %130 {offsets = [1, 0], sizes = [1, 2], strides = [1, 1]} : vector<4x2xf32> to vector<1x2xf32>
    %134 = arith.mulf %133, %116 : vector<1x2xf32>
    %135 = vector.extract_strided_slice %130 {offsets = [0, 0], sizes = [1, 2], strides = [1, 1]} : vector<4x2xf32> to vector<1x2xf32>
    %136 = arith.mulf %135, %132 : vector<1x2xf32>
    %137 = arith.addf %134, %136 : vector<1x2xf32>
    %138 = vector.extract_strided_slice %130 {offsets = [3, 0], sizes = [1, 2], strides = [1, 1]} : vector<4x2xf32> to vector<1x2xf32>
    %139 = math.tanh %137 : vector<1x2xf32>
    %140 = arith.mulf %138, %139 : vector<1x2xf32>
    %141 = vector.extract_strided_slice %12 {offsets = [6, 0, 0], sizes = [1, 4, 2], strides = [1, 1, 1]} : vector<8x4x2xf32> to vector<1x4x2xf32>
    %142 = vector.shape_cast %141 : vector<1x4x2xf32> to vector<4x2xf32>
    %143 = vector.broadcast %2 : vector<4x1xf32> to vector<4x2xf32>
    %144 = vector.broadcast %140 : vector<1x2xf32> to vector<4x2xf32>
    %145 = arith.mulf %143, %144 : vector<4x2xf32>
    %146 = arith.addf %142, %145 : vector<4x2xf32>
    %147 = arith.negf %146 : vector<4x2xf32>
    %148 = math.exp %147 : vector<4x2xf32>
    %cst_14 = arith.constant 1.000000e+00 : f32
    %149 = vector.broadcast %cst_14 : f32 to vector<4x2xf32>
    %150 = arith.addf %149, %148 : vector<4x2xf32>
    %151 = arith.divf %149, %150 : vector<4x2xf32>
    %152 = vector.extract_strided_slice %146 {offsets = [2, 0], sizes = [1, 2], strides = [1, 1]} : vector<4x2xf32> to vector<1x2xf32>
    %153 = math.tanh %152 : vector<1x2xf32>
    %154 = vector.extract_strided_slice %151 {offsets = [1, 0], sizes = [1, 2], strides = [1, 1]} : vector<4x2xf32> to vector<1x2xf32>
    %155 = arith.mulf %154, %137 : vector<1x2xf32>
    %156 = vector.extract_strided_slice %151 {offsets = [0, 0], sizes = [1, 2], strides = [1, 1]} : vector<4x2xf32> to vector<1x2xf32>
    %157 = arith.mulf %156, %153 : vector<1x2xf32>
    %158 = arith.addf %155, %157 : vector<1x2xf32>
    %159 = vector.extract_strided_slice %151 {offsets = [3, 0], sizes = [1, 2], strides = [1, 1]} : vector<4x2xf32> to vector<1x2xf32>
    %160 = math.tanh %158 : vector<1x2xf32>
    %161 = arith.mulf %159, %160 : vector<1x2xf32>
    %162 = vector.extract_strided_slice %12 {offsets = [7, 0, 0], sizes = [1, 4, 2], strides = [1, 1, 1]} : vector<8x4x2xf32> to vector<1x4x2xf32>
    %163 = vector.shape_cast %162 : vector<1x4x2xf32> to vector<4x2xf32>
    %164 = vector.broadcast %2 : vector<4x1xf32> to vector<4x2xf32>
    %165 = vector.broadcast %161 : vector<1x2xf32> to vector<4x2xf32>
    %166 = arith.mulf %164, %165 : vector<4x2xf32>
    %167 = arith.addf %163, %166 : vector<4x2xf32>
    %168 = arith.negf %167 : vector<4x2xf32>
    %169 = math.exp %168 : vector<4x2xf32>
    %cst_15 = arith.constant 1.000000e+00 : f32
    %170 = vector.broadcast %cst_15 : f32 to vector<4x2xf32>
    %171 = arith.addf %170, %169 : vector<4x2xf32>
    %172 = arith.divf %170, %171 : vector<4x2xf32>
    %173 = vector.extract_strided_slice %167 {offsets = [2, 0], sizes = [1, 2], strides = [1, 1]} : vector<4x2xf32> to vector<1x2xf32>
    %174 = math.tanh %173 : vector<1x2xf32>
    %175 = vector.extract_strided_slice %172 {offsets = [1, 0], sizes = [1, 2], strides = [1, 1]} : vector<4x2xf32> to vector<1x2xf32>
    %176 = arith.mulf %175, %158 : vector<1x2xf32>
    %177 = vector.extract_strided_slice %172 {offsets = [0, 0], sizes = [1, 2], strides = [1, 1]} : vector<4x2xf32> to vector<1x2xf32>
    %178 = arith.mulf %177, %174 : vector<1x2xf32>
    %179 = arith.addf %176, %178 : vector<1x2xf32>
    %180 = vector.extract_strided_slice %172 {offsets = [3, 0], sizes = [1, 2], strides = [1, 1]} : vector<4x2xf32> to vector<1x2xf32>
    %181 = math.tanh %179 : vector<1x2xf32>
    %182 = arith.mulf %180, %181 : vector<1x2xf32>
    %c0_16 = arith.constant 0 : index
    %c0_17 = arith.constant 0 : index
    %183 = vector.load %arg4[%c0_16, %c0_17] : memref<1x2xf32, #tpu.memory_space<vmem>>, vector<1x2xf32>
    tpu.vector_store %arg4[%c0_16, %c0_17], %182 {strides = array<i32>} : memref<1x2xf32, #tpu.memory_space<vmem>>, vector<1x2xf32>,
    return
  }
}

</mosaic_0001>

<bundles_post_ra>
// kernel: tpu_custom_call.1
= control target key start
LH: loop header
LB: loop body
LE: loop exit
PB: predicated region body
PF: predicated region fallthrough
CT: control target
= control target key end

     0   :  { %v505_v1 = vmov 0   ;;  %s591_s0 = inlined_call_operand.vmem [shape: f32[2,8], index: 0, kind: input, shape index: {}]   ;;  %s592_s1 = inlined_call_operand.vmem [shape: f32[4,1], index: 1, kind: input, shape index: {}]   ;;  %s593_s2 = inlined_call_operand.vmem [shape: f32[4,1], index: 2, kind: input, shape index: {}]   ;;  %s594_s3 = inlined_call_operand.vmem [shape: f32[4,1], index: 3, kind: input, shape index: {}]   ;;  %s595_s4 = inlined_call_operand.hbm [shape: f32[1,2], index: 4, kind: output, shape index: {}]  }
   0x1   :  { %v20_v0 = vld [vmem:[%s593_s2] sm:$0xf]  ;;  %416 = vset.pattern.permute.xlu1 %v505_v1  ;;  %415 = vset.pattern.permute.xlu0 %v505_v1 }
   0x2   :  { %v19_v2 = vld [vmem:[%s592_s1] sm:$0xf]  ;;  %172 = vperm.xlu1 %416, %v20_v0  }
   0x3   :  { %146 = vperm.xlu0 %415, %v19_v2  }
   0x4   :  { %9 = vsyncpa [#allocation3], 0  ;;  %v21_v3 = vld [vmem:[%s594_s3] sm:$0xf]  ;;  %v506_v5 = vmov 1966171168   ;;  %v59_v7 = vlaneseq }
   0x5   :  { %v18_v4 = vld [vmem:[%s591_s0] sm:$0x3]  ;;  %v57_v6 = vunpack.c.l.s4 %v506_v5  ;;  %s507_s0 = smov [#allocation2]   ;;  %vm387_vm0 = vcmask 11267  }
   0x6   :  { %v60_v9 = vshrl.u32 %v59_v7, 7  ;;  %s395_s1 = sshll.u32 %s507_s0, 4  ;;  %s396_s1 = int_to_ptr.vmem [resolvable:$true] %s395_s1 }
   0x7   :  { %159 = vperm.xlu0 %415, %v21_v3   ;;  %v58_v8 = vunpack.c.0.s8 %v57_v6  ;;  %s481_s2 = scalar_lea.vmem %s396_s1, 16  ;;  %s485_s3 = scalar_lea.vmem %s396_s1, 32 }
   0x8   :  { %v106_v15 = vsub.s32 0, %v60_v9  ;;  %v558_v0 = vsub.s32 3, %v60_v9  ;;  %p482_p0 = scmp.ne.s32.totalorder %s396_s1, %s481_s2  ;;  %p486_p1 = scmp.lt.s32.totalorder %s396_s1, %s396_s1 }
   0x9   :  { %v61_v11 = vsub.s32 %v58_v8, %v60_v9  ;;  %p487_p2 = scmp.lt.s32.totalorder %s485_s3, %s481_s2 }
   0xb   :  { %p488_p3 = por %p487_p2, %p486_p1 }
   0xd   :  { %p489_p4 = pnand %p488_p3, %p482_p0 }
  0x2b   :  { %22 = vxpose.xlu1.b32.start.end [1/1] (short) (narrow) %v18_v4, 8 }
  0x81   :  { %v545_v10 = vpop.permute.xlu1 %172 }
  0x82   :  { %v147_v16 = vpop.permute.xlu0 %146  ;;  %v175_v38 = vmul.f32 0.0, %v545_v10 }
  0x86   :  { %v160_v35 = vpop.permute.xlu0 %159 }
  0xab   :  { %v38_v12 = vpop.trf.xlu1 }
  0xac   :  { %v55_v13 = vcombine.high %v38_v12, %v38_v12  ;;  %v62_v14 = vrot.slane %v38_v12, %v61_v11 }
  0xae   :  { %v69_v17 = vrot.slane %v55_v13, %v61_v11  ;;  %v70_v18 = vcombine.high %v62_v14, %v62_v14  ;;  %v78_v19 = vrot.slane %v62_v14, %v61_v11 }
  0xb0   :  { %v71_v20 = vcombine.high %v69_v17, %v69_v17  ;;  %v85_v21 = vrot.slane %v69_v17, %v61_v11  ;;  %v92_v22 = vrot.slane %v70_v18, %v61_v11  ;;  %v100_v23 = vcombine.high %v78_v19, %v78_v19 }
  0xb1   :  { %v107_v24 = vrot.slane %v78_v19, %v106_v15 }
  0xb2   :  { %v99_v25 = vrot.slane %v71_v20, %v61_v11  ;;  %v101_v26 = vcombine.high %v85_v21, %v85_v21  ;;  %v102_v27 = vcombine.high %v92_v22, %v92_v22  ;;  %v115_v28 = vrot.slane %v100_v23, %v106_v15 }
  0xb3   :  { %v123_v29 = vrot.slane %v85_v21, %v106_v15  ;;  %v149_v30 = vmul.f32 %v147_v16, %v107_v24  ;;  %v111_v62 = vrot.slane %v92_v22, %v106_v15 }
  0xb4   :  { %v103_v31 = vcombine.high %v99_v25, %v99_v25  ;;  %v119_v32 = vrot.slane %v102_v27, %v106_v15  ;;  %v127_v33 = vrot.slane %v99_v25, %v106_v15  ;;  %v131_v34 = vrot.slane %v101_v26, %v106_v15 }
  0xb5   :  { %v151_v36 = vmul.f32 %v147_v16, %v115_v28  ;;  %v153_v37 = vmul.f32 %v147_v16, %v123_v29  ;;  %v162_v39 = vadd.f32 %v160_v35, %v149_v30  ;;  %v150_v2 = vmul.f32 %v147_v16, %v111_v62 }
  0xb6   :  { %v135_v40 = vrot.slane %v103_v31, %v106_v15  ;;  %v152_v41 = vmul.f32 %v147_v16, %v119_v32  ;;  %v154_v42 = vmul.f32 %v147_v16, %v127_v33  ;;  %v155_v43 = vmul.f32 %v147_v16, %v131_v34 }
  0xb7   :  { %v164_v44 = vadd.f32 %v160_v35, %v151_v36  ;;  %v548_v45 = vadd.f32 %v160_v35, %v153_v37  ;;  %v176_v46 = vadd.f32 %v175_v38, %v162_v39  ;;  %v163_v5 = vadd.f32 %v160_v35, %v150_v2 }
  0xb8   :  { %v156_v47 = vmul.f32 %v147_v16, %v135_v40  ;;  %v550_v48 = vadd.f32 %v160_v35, %v152_v41  ;;  %v552_v49 = vadd.f32 %v160_v35, %v154_v42  ;;  %v554_v50 = vadd.f32 %v160_v35, %v155_v43 }
  0xb9   :  { %v403_v51 = vmul.f32 -1.442695, %v176_v46 }
  0xba   :  { %v556_v52 = vadd.f32 %v160_v35, %v156_v47 }
  0xbb   :  { %417 = vpow2.f32 %v403_v51 }
  0xbc   :  { %419 = vtanh.f32 %v176_v46 }
  0xc5   :  { %v418_v53 = vpop.eup %417 }
  0xc6   :  { %v180_v54 = vadd.f32 1.0, %v418_v53  ;;  %v420_v55 = vpop.eup %419 }
  0xc7   :  { %v186_v56 = vrot.slane %v420_v55, 2 }
  0xc8   :  { %421 = vrcp.f32 %v180_v54 }
  0xd2   :  { %v422_v57 = vpop.eup %421 }
  0xd3   :  { %v188_v58 = vmul.f32 %v422_v57, %v186_v56  ;;  %v184_v59 = vmul.f32 0.0, %v422_v57 }
  0xd5   :  { %v190_v60 = vrot.slane %v188_v58, 7 }
  0xd7   :  { %v192_v61 = vadd.f32 %v190_v60, %v184_v59 }
  0xd9   :  { %423 = vtanh.f32 %v192_v61 }
  0xe3   :  { %v424_v63 = vpop.eup %423 }
  0xe4   :  { %v195_v1 = vrot.slane %v424_v63, 6 }
  0xe6   :  { %v197_v3 = vmul.f32 %v422_v57, %v195_v1 }
  0xe8   :  { %v201_v4 = vrot.slane %v197_v3, %v558_v0 }
  0xea   :  { %v202_v6 = vmul.f32 %v201_v4, %v545_v10 }
  0xec   :  { %v203_v7 = vadd.f32 %v202_v6, %v163_v5 }
  0xee   :  { %v404_v8 = vmul.f32 -1.442695, %v203_v7 }
  0xf0   :  { %425 = vpow2.f32 %v404_v8 }
  0xf1   :  { %427 = vtanh.f32 %v203_v7 }
  0xfa   :  { %v426_v11 = vpop.eup %425 }
  0xfb   :  { %v207_v12 = vadd.f32 1.0, %v426_v11  ;;  %v428_v13 = vpop.eup %427 }
  0xfc   :  { %v213_v14 = vrot.slane %v428_v13, 2 }
  0xfd   :  { %429 = vrcp.f32 %v207_v12 }
 0x107   :  { %v430_v15 = vpop.eup %429 }
 0x108   :  { %v215_v9 = vmul.f32 %v430_v15, %v213_v14  ;;  %v211_v17 = vmul.f32 %v430_v15, %v192_v61 }
 0x10a   :  { %v217_v18 = vrot.slane %v215_v9, 7 }
 0x10c   :  { %v219_v16 = vadd.f32 %v217_v18, %v211_v17 }
 0x10e   :  { %431 = vtanh.f32 %v219_v16 }
 0x118   :  { %v432_v19 = vpop.eup %431 }
 0x119   :  { %v222_v20 = vrot.slane %v432_v19, 6 }
 0x11b   :  { %v224_v21 = vmul.f32 %v430_v15, %v222_v20 }
 0x11d   :  { %v228_v22 = vrot.slane %v224_v21, %v558_v0 }
 0x11f   :  { %v229_v23 = vmul.f32 %v228_v22, %v545_v10 }
 0x121   :  { %v230_v24 = vadd.f32 %v229_v23, %v164_v44 }
 0x123   :  { %v405_v25 = vmul.f32 -1.442695, %v230_v24 }
 0x125   :  { %433 = vpow2.f32 %v405_v25 }
 0x126   :  { %435 = vtanh.f32 %v230_v24 }
 0x12f   :  { %v434_v26 = vpop.eup %433 }
 0x130   :  { %v234_v27 = vadd.f32 1.0, %v434_v26  ;;  %v436_v28 = vpop.eup %435 }
 0x131   :  { %v240_v29 = vrot.slane %v436_v28, 2 }
 0x132   :  { %437 = vrcp.f32 %v234_v27 }
 0x13c   :  { %v438_v30 = vpop.eup %437 }
 0x13d   :  { %v242_v31 = vmul.f32 %v438_v30, %v240_v29  ;;  %v238_v32 = vmul.f32 %v438_v30, %v219_v16 }
 0x13f   :  { %v244_v33 = vrot.slane %v242_v31, 7 }
 0x141   :  { %v246_v34 = vadd.f32 %v244_v33, %v238_v32 }
 0x143   :  { %439 = vtanh.f32 %v246_v34 }
 0x14d   :  { %v440_v35 = vpop.eup %439 }
 0x14e   :  { %v249_v36 = vrot.slane %v440_v35, 6 }
 0x150   :  { %v251_v37 = vmul.f32 %v438_v30, %v249_v36 }
 0x152   :  { %v255_v38 = vrot.slane %v251_v37, %v558_v0 }
 0x154   :  { %v256_v39 = vmul.f32 %v255_v38, %v545_v10 }
 0x156   :  { %v257_v40 = vadd.f32 %v256_v39, %v550_v48 }
 0x158   :  { %v406_v41 = vmul.f32 -1.442695, %v257_v40 }
 0x15a   :  { %441 = vpow2.f32 %v406_v41 }
 0x15b   :  { %443 = vtanh.f32 %v257_v40 }
 0x164   :  { %v442_v42 = vpop.eup %441 }
 0x165   :  { %v261_v43 = vadd.f32 1.0, %v442_v42  ;;  %v444_v44 = vpop.eup %443 }
 0x166   :  { %v267_v46 = vrot.slane %v444_v44, 2 }
 0x167   :  { %445 = vrcp.f32 %v261_v43 }
 0x171   :  { %v446_v47 = vpop.eup %445 }
 0x172   :  { %v265_v51 = vmul.f32 %v446_v47, %v246_v34  ;;  %v269_v53 = vmul.f32 %v446_v47, %v267_v46 }
 0x174   :  { %v271_v54 = vrot.slane %v269_v53, 7 }
 0x176   :  { %v273_v55 = vadd.f32 %v271_v54, %v265_v51 }
 0x178   :  { %447 = vtanh.f32 %v273_v55 }
 0x182   :  { %v448_v56 = vpop.eup %447 }
 0x183   :  { %v276_v57 = vrot.slane %v448_v56, 6 }
 0x185   :  { %v278_v58 = vmul.f32 %v446_v47, %v276_v57 }
 0x187   :  { %v282_v59 = vrot.slane %v278_v58, %v558_v0 }
 0x189   :  { %v283_v48 = vmul.f32 %v282_v59, %v545_v10 }
 0x18b   :  { %v284_v60 = vadd.f32 %v283_v48, %v548_v45 }
 0x18d   :  { %v407_v61 = vmul.f32 -1.442695, %v284_v60 }
 0x18f   :  { %449 = vpow2.f32 %v407_v61 }
 0x190   :  { %451 = vtanh.f32 %v284_v60 }
 0x199   :  { %v450_v62 = vpop.eup %449 }
 0x19a   :  { %v288_v63 = vadd.f32 1.0, %v450_v62  ;;  %v452_v1 = vpop.eup %451 }
 0x19b   :  { %v294_v2 = vrot.slane %v452_v1, 2 }
 0x19c   :  { %453 = vrcp.f32 %v288_v63 }
 0x1a6   :  { %v454_v3 = vpop.eup %453 }
 0x1a7   :  { %v292_v4 = vmul.f32 %v454_v3, %v273_v55  ;;  %v296_v5 = vmul.f32 %v454_v3, %v294_v2 }
 0x1a9   :  { %v298_v6 = vrot.slane %v296_v5, 7 }
 0x1ab   :  { %v300_v7 = vadd.f32 %v298_v6, %v292_v4 }
 0x1ad   :  { %455 = vtanh.f32 %v300_v7 }
 0x1b7   :  { %v456_v8 = vpop.eup %455 }
 0x1b8   :  { %v303_v11 = vrot.slane %v456_v8, 6 }
 0x1ba   :  { %v305_v12 = vmul.f32 %v454_v3, %v303_v11 }
 0x1bc   :  { %v309_v13 = vrot.slane %v305_v12, %v558_v0 }
 0x1be   :  { %v310_v45 = vmul.f32 %v309_v13, %v545_v10 }
 0x1c0   :  { %v311_v14 = vadd.f32 %v310_v45, %v552_v49 }
 0x1c2   :  { %v408_v15 = vmul.f32 -1.442695, %v311_v14 }
 0x1c4   :  { %457 = vpow2.f32 %v408_v15 }
 0x1c5   :  { %459 = vtanh.f32 %v311_v14 }
 0x1ce   :  { %v458_v9 = vpop.eup %457 }
 0x1cf   :  { %v315_v17 = vadd.f32 1.0, %v458_v9  ;;  %v460_v18 = vpop.eup %459 }
 0x1d0   :  { %v321_v16 = vrot.slane %v460_v18, 2 }
 0x1d1   :  { %461 = vrcp.f32 %v315_v17 }
 0x1db   :  { %v462_v19 = vpop.eup %461 }
 0x1dc   :  { %v319_v20 = vmul.f32 %v462_v19, %v300_v7  ;;  %v323_v21 = vmul.f32 %v462_v19, %v321_v16 }
 0x1de   :  { %v325_v22 = vrot.slane %v323_v21, 7 }
 0x1e0   :  { %v327_v23 = vadd.f32 %v325_v22, %v319_v20 }
 0x1e2   :  { %463 = vtanh.f32 %v327_v23 }
 0x1ec   :  { %v464_v24 = vpop.eup %463 }
 0x1ed   :  { %v330_v25 = vrot.slane %v464_v24, 6 }
 0x1ef   :  { %v332_v26 = vmul.f32 %v462_v19, %v330_v25 }
 0x1f1   :  { %v336_v27 = vrot.slane %v332_v26, %v558_v0 }
 0x1f3   :  { %v337_v49 = vmul.f32 %v336_v27, %v545_v10 }
 0x1f5   :  { %v338_v28 = vadd.f32 %v337_v49, %v554_v50 }
 0x1f7   :  { %v409_v29 = vmul.f32 -1.442695, %v338_v28 }
 0x1f9   :  { %465 = vpow2.f32 %v409_v29 }
 0x1fa   :  { %467 = vtanh.f32 %v338_v28 }
 0x203   :  { %v466_v30 = vpop.eup %465 }
 0x204   :  { %v342_v31 = vadd.f32 1.0, %v466_v30  ;;  %v468_v32 = vpop.eup %467 }
 0x205   :  { %v348_v33 = vrot.slane %v468_v32, 2 }
 0x206   :  { %469 = vrcp.f32 %v342_v31 }
 0x210   :  { %v470_v34 = vpop.eup %469 }
 0x211   :  { %v346_v35 = vmul.f32 %v470_v34, %v327_v23  ;;  %v350_v36 = vmul.f32 %v470_v34, %v348_v33 }
 0x213   :  { %v352_v37 = vrot.slane %v350_v36, 7 }
 0x215   :  { %v354_v38 = vadd.f32 %v352_v37, %v346_v35 }
 0x217   :  { %471 = vtanh.f32 %v354_v38 }
 0x221   :  { %v472_v39 = vpop.eup %471 }
 0x222   :  { %v357_v40 = vrot.slane %v472_v39, 6 }
 0x224   :  { %v359_v41 = vmul.f32 %v470_v34, %v357_v40 }
 0x226   :  { %v363_v42 = vrot.slane %v359_v41, %v558_v0 }
 0x228   :  { %v364_v50 = vmul.f32 %v363_v42, %v545_v10 }
 0x22a   :  { %v365_v43 = vadd.f32 %v364_v50, %v556_v52 }
 0x22c   :  { %v410_v44 = vmul.f32 -1.442695, %v365_v43 }
 0x22e   :  { %473 = vpow2.f32 %v410_v44 }
 0x22f   :  { %475 = vtanh.f32 %v365_v43 }
 0x238   :  { %v474_v46 = vpop.eup %473 }
 0x239   :  { %v369_v47 = vadd.f32 1.0, %v474_v46  ;;  %v476_v51 = vpop.eup %475 }
 0x23a   :  { %v375_v53 = vrot.slane %v476_v51, 2 }
 0x23b   :  { %477 = vrcp.f32 %v369_v47 }
 0x245   :  { %v478_v54 = vpop.eup %477 }
 0x246   :  { %v373_v55 = vmul.f32 %v478_v54, %v354_v38  ;;  %v377_v56 = vmul.f32 %v478_v54, %v375_v53 }
 0x248   :  { %v379_v57 = vrot.slane %v377_v56, 7 }
 0x24a   :  { %v381_v58 = vadd.f32 %v379_v57, %v373_v55 }
 0x24c   :  { %479 = vtanh.f32 %v381_v58 }
 0x256   :  { %v480_v59 = vpop.eup %479 }
 0x257   :  { %v384_v10 = vrot.slane %v480_v59, 6 }
 0x259   :  { %v386_v52 = vmul.f32 %v478_v54, %v384_v10 }
 0x25b   :  { %388 = vst.msk [vmem:[#allocation2 - $0x3] sm:$0x8] %vm387_vm0, %v386_v52 }
 0x25c   :  { %492 = shalt.err (!%p489_p4)
}
 0x25d   :  { %s493_s25 = scalar_lea.hbm %s595_s4, 16 }
 0x25e   :  { %p494_p5 = scmp.ne.s32.totalorder %s595_s4, %s493_s25  ;;  %p497_p6 = scmp.lt.u32.totalorder %s493_s25, %s595_s4 }
 0x260   :  { %p499_p7 = pnand %p497_p6, %p494_p5 }
 0x262   :  { %502 = shalt.err (!%p499_p7)
}
 0x263   :  { %398 = dma.vmem_to_hbm [thread:$0]  %s396_s1, 16, %s595_s4, [#allocation3]  }
 0x264   :  { %503 = dma.done.wait [#allocation3], 16  }
 0x265   :  { %504 = vsyncadd [#allocation3], 4294967280 }
 0x266   :  { %402 = vsyncpa [#allocation3], 1 }

</bundles_post_ra>
